<compile_context>
chip_gen: v7x
topology: tpu7x:2x2x1
jax: 0.10.0
libtpu: 0.0.40
codegen_flags: <defaults>
</compile_context>

<pallas_src>
import jax
import jax.numpy as jnp
from jax.experimental import pallas as pl
from jax.experimental.pallas import tpu as pltpu

LEAKY_SLOPE = 0.2   # spirl MLP builder uses LeakyReLU(0.2)
LANES = 128         # TPU vreg lane width; all feature dims are padded to this.

# Weight-slab entries (leading axis of the packed [NW, 128, 128] slab).
W1A_L, W1A_R, W2A, W_MU, W_LS, W_EPS, W1B_Z, W1B_L, W1B_R, W2B, W3B = range(11)
NW = 11
# Bias-slab entries (leading axis of the packed [NB, 1, 128] slab).
B1A, B2A, B_MU, B_LS, B1B, B2B, B3B = range(7)
NB = 7


def _leaky_relu(x):
    return jnp.where(x > 0, x, LEAKY_SLOPE * x)


def _round_up(x, m):
    return ((x + m - 1) // m) * m


def _choose_b_tile(b_pad, max_tile=512, min_steps=2):
    """Largest multiple-of-8 tile that divides b_pad, is <= max_tile and leaves
    >= min_steps grid steps (so the v7x megacore can split the batch)."""
    best = None
    t = 8
    top = min(b_pad, max_tile)
    while t <= top:
        if b_pad % t == 0 and b_pad // t >= min_steps:
            best = t
        t += 8
    return best if best is not None else min(b_pad, max_tile)


# --------------------------------------------------------------------------- #
# Kernel
# --------------------------------------------------------------------------- #
def _twolayer_prior_kernel(el_ref, er_ref, eps_ref, w_ref, b_ref, out_ref):
    """One batch tile of the fused forward pass.

    el_ref  : [Bt, d_e] f32      e_l
    er_ref  : [Bt, d_e] f32      e_r
    eps_ref : [Bt, nz]  f32      Gaussian.sample() noise draw
    w_ref   : [11, 128, 128]     packed weights (bf16 by default; zero-padded,
                                 pre-split by input rows / output-lane offsets)
    b_ref   : [7, 1, 128] f32    packed bias rows (lane offsets baked in)
    out_ref : [Bt, 128] f32      packed output: g1 | z1 | g2 at disjoint lanes
    """
    d_e = el_ref.shape[-1]
    nz = eps_ref.shape[-1]
    z_lo = 2 * nz                     # z1 lanes [2nz, 3nz); g2 at [3nz, 5nz)
    wdt = w_ref.dtype

    # Hoisted operand casts (each feeds two dots).
    e_l = el_ref[...].astype(wdt)
    e_r = er_ref[...].astype(wdt)
    eps = eps_ref[...].astype(wdt)

    def dotw(a, k, rows):
        # MXU dot against weight-slab entry k (first `rows` rows), f32 accumulate.
        return jnp.dot(a, w_ref[k, :rows, :], preferred_element_type=jnp.float32)

    # ---- g1 = p1(e_l, e_r):  concat(e_l, e_r) @ W1a  ==  e_l @ W1a_L + e_r @ W1a_R
    h = _leaky_relu(dotw(e_l, W1A_L, d_e) + dotw(e_r, W1A_R, d_e) + b_ref[B1A])
    h = _leaky_relu(dotw(h.astype(wdt), W2A, LANES) + b_ref[B2A])
    h = h.astype(wdt)
    mu_d = dotw(h, W_MU, LANES) + b_ref[B_MU]   # mu columns at [0,nz) AND z1 lanes
    ls_d = dotw(h, W_LS, LANES) + b_ref[B_LS]   # log_sigma at [nz,2nz) AND z1 lanes
    eps_d = dotw(eps, W_EPS, nz)                # identity block: eps at z1 lanes, 0 else

    # ---- z1 = mu + exp(log_sigma)*eps, fused into the packed g1|z1 lane layout.
    # lanes [0,nz): mu;  [nz,2nz): log_sigma;  [z_lo,z_lo+nz): mu + exp(ls)*eps; else 0.
    lane = jax.lax.broadcasted_iota(jnp.int32, mu_d.shape, 1)
    z_mask = (lane >= z_lo) & (lane < z_lo + nz)
    g1z1 = mu_d + jnp.where(z_mask, jnp.exp(ls_d) * eps_d, ls_d)

    # ---- g2 = q_p_shared(z1, e_l, e_r)
    # concat(z1, e_l, e_r) @ W1b == g1z1 @ W1b_Z (rows only at z1 lanes)
    #                              + e_l @ W1b_L + e_r @ W1b_R
    h2 = _leaky_relu(dotw(g1z1.astype(wdt), W1B_Z, LANES)
                     + dotw(e_l, W1B_L, d_e) + dotw(e_r, W1B_R, d_e) + b_ref[B1B])
    h2 = _leaky_relu(dotw(h2.astype(wdt), W2B, LANES) + b_ref[B2B])
    g2 = dotw(h2.astype(wdt), W3B, LANES) + b_ref[B3B]     # columns at [3nz, 5nz)

    # g1z1 and g2 have disjoint, zero-padded lane support -> single full-lane store.
    out_ref[...] = g1z1 + g2


# --------------------------------------------------------------------------- #
# Parameter packing (trace-time layout plumbing, not compute)
# --------------------------------------------------------------------------- #
def pack_params(params, d_e, nz, nz_mid, dot_dtype=jnp.bfloat16):
    """Pack the 12 weight/bias arrays into two lane-padded slabs (done once).

    Row-splitting replaces in-kernel concatenation; column offsets place every
    result directly at its lane range in the single packed output slab."""
    (w1a, b1a, w2a, b2a, w3a, b3a,
     w1b, b1b, w2b, b2b, w3b, b3b) = params

    assert 5 * nz <= LANES, "output slab layout needs 5*nz <= 128"
    assert 2 * d_e <= LANES and nz_mid <= LANES

    z_lo = 2 * nz          # z1 lanes
    g2_lo = 3 * nz         # g2 lanes

    W = jnp.zeros((NW, LANES, LANES), jnp.float32)
    # p1 layer 1, split by input rows (e_l rows / e_r rows).
    W = W.at[W1A_L, :d_e, :nz_mid].set(w1a[:d_e])
    W = W.at[W1A_R, :d_e, :nz_mid].set(w1a[d_e:])
    W = W.at[W2A, :nz_mid, :nz_mid].set(w2a)
    # p1 layer 3: mu / log_sigma columns duplicated at the g1 lanes and the z1 lanes.
    W = W.at[W_MU, :nz_mid, :nz].set(w3a[:, :nz])
    W = W.at[W_MU, :nz_mid, z_lo:z_lo + nz].set(w3a[:, :nz])
    W = W.at[W_LS, :nz_mid, nz:2 * nz].set(w3a[:, nz:])
    W = W.at[W_LS, :nz_mid, z_lo:z_lo + nz].set(w3a[:, nz:])
    # eps lane placement: identity block mapping eps lane k -> lane z_lo + k.
    W = W.at[W_EPS, :nz, z_lo:z_lo + nz].set(jnp.eye(nz, dtype=jnp.float32))
    # q_p_shared layer 1, split by input rows; z1 rows moved to the z1 lanes so the
    # packed g1|z1 slab is consumed in place.
    W = W.at[W1B_Z, z_lo:z_lo + nz, :nz_mid].set(w1b[:nz])
    W = W.at[W1B_L, :d_e, :nz_mid].set(w1b[nz:nz + d_e])
    W = W.at[W1B_R, :d_e, :nz_mid].set(w1b[nz + d_e:])
    W = W.at[W2B, :nz_mid, :nz_mid].set(w2b)
    # q_p_shared layer 3: columns shifted to the g2 lanes of the output slab.
    W = W.at[W3B, :nz_mid, g2_lo:g2_lo + 2 * nz].set(w3b)
    W = W.astype(dot_dtype)   # bf16 default: half the weight DMA, native MXU path

    Bv = jnp.zeros((NB, 1, LANES), jnp.float32)   # biases stay f32 (VPU adds in f32)
    Bv = Bv.at[B1A, 0, :nz_mid].set(b1a[0])
    Bv = Bv.at[B2A, 0, :nz_mid].set(b2a[0])
    Bv = Bv.at[B_MU, 0, :nz].set(b3a[0, :nz])
    Bv = Bv.at[B_MU, 0, z_lo:z_lo + nz].set(b3a[0, :nz])
    Bv = Bv.at[B_LS, 0, nz:2 * nz].set(b3a[0, nz:])
    Bv = Bv.at[B_LS, 0, z_lo:z_lo + nz].set(b3a[0, nz:])
    Bv = Bv.at[B1B, 0, :nz_mid].set(b1b[0])
    Bv = Bv.at[B2B, 0, :nz_mid].set(b2b[0])
    Bv = Bv.at[B3B, 0, g2_lo:g2_lo + 2 * nz].set(b3b[0])
    return W, Bv


# --------------------------------------------------------------------------- #
# Wrapper
# --------------------------------------------------------------------------- #
def twolayer_prior_shared_pq(e_l, e_r, eps, packed_w, packed_b, *, b_tile=None):
    """Fused forward pass. Returns (g1, z1, g2) — the contents of
    SequentialGaussian_SharedPQ(g1, z1, g2)."""
    B, d_e = e_l.shape
    nz = eps.shape[-1]

    if b_tile is None:
        b_pad = _round_up(B, 8)                   # b_pad ~= B: no wasted rows
        b_tile = _choose_b_tile(b_pad)            # >= 2 grid steps when possible
    else:
        b_tile = _round_up(b_tile, 8)
        b_pad = _round_up(B, b_tile)

    if b_pad != B:                                # only pad to the next sublane multiple
        pad = ((0, b_pad - B), (0, 0))
        e_l = jnp.pad(e_l, pad)
        e_r = jnp.pad(e_r, pad)
        eps = jnp.pad(eps, pad)

    grid = (b_pad // b_tile,)

    flops = 2 * b_pad * LANES * (4 * d_e + nz + 6 * LANES)
    bytes_accessed = (b_pad * (2 * d_e + nz + LANES) * 4
                      + packed_w.size * packed_w.dtype.itemsize
                      + packed_b.size * packed_b.dtype.itemsize)

    out = pl.pallas_call(
        _twolayer_prior_kernel,
        out_shape=jax.ShapeDtypeStruct((b_pad, LANES), jnp.float32),
        grid=grid,
        in_specs=[
            pl.BlockSpec((b_tile, d_e), lambda i: (i, 0)),
            pl.BlockSpec((b_tile, d_e), lambda i: (i, 0)),
            pl.BlockSpec((b_tile, nz), lambda i: (i, 0)),
            pl.BlockSpec((NW, LANES, LANES), lambda i: (0, 0, 0)),  # VMEM-resident
            pl.BlockSpec((NB, 1, LANES), lambda i: (0, 0, 0)),
        ],
        out_specs=pl.BlockSpec((b_tile, LANES), lambda i: (i, 0)),
        compiler_params=pltpu.CompilerParams(
            dimension_semantics=("parallel",)),   # batch axis: shard across TCs on v7x
        cost_estimate=pl.CostEstimate(
            flops=flops, transcendentals=b_pad * LANES,
            bytes_accessed=bytes_accessed),
    )(e_l, e_r, eps, packed_w, packed_b)

    g1 = out[:B, :2 * nz]
    z1 = out[:B, 2 * nz:3 * nz]
    g2 = out[:B, 3 * nz:5 * nz]
    return g1, z1, g2


# --------------------------------------------------------------------------- #
# Deterministic parameter init + pure-JAX reference
# --------------------------------------------------------------------------- #
def init_params(key, d_e, nz, nz_mid):
    """Weights stored as [Din, Dout] (transpose of nn.Linear's [Dout, Din])."""
    d_in_p1 = 2 * d_e          # concat(e_l, e_r)
    d_in_q = nz + 2 * d_e      # concat(z1, e_l, e_r)
    d_out = 2 * nz             # [mu, log_sigma]

    ks = jax.random.split(key, 6)

    def lin(k, din, dout):
        scale = 1.0 / jnp.sqrt(jnp.float32(din))
        w = jax.random.normal(k, (din, dout), jnp.float32) * scale
        b = jnp.zeros((1, dout), jnp.float32)
        return w, b

    w1a, b1a = lin(ks[0], d_in_p1, nz_mid)
    w2a, b2a = lin(ks[1], nz_mid, nz_mid)
    w3a, b3a = lin(ks[2], nz_mid, d_out)
    w1b, b1b = lin(ks[3], d_in_q, nz_mid)
    w2b, b2b = lin(ks[4], nz_mid, nz_mid)
    w3b, b3b = lin(ks[5], nz_mid, d_out)

    return (w1a, b1a, w2a, b2a, w3a, b3a,
            w1b, b1b, w2b, b2b, w3b, b3b)


def _reference(e_l, e_r, eps, params, dot_dtype=jnp.bfloat16):
    """Pure-JAX reference with the same cast points as the kernel."""
    (w1a, b1a, w2a, b2a, w3a, b3a,
     w1b, b1b, w2b, b2b, w3b, b3b) = params

    def dot(a, w):
        return jnp.dot(a.astype(dot_dtype), w.astype(dot_dtype),
                       preferred_element_type=jnp.float32)

    def mlp3(x, w1, b1, w2, b2, w3, b3):
        h = _leaky_relu(dot(x, w1) + b1)
        h = _leaky_relu(dot(h, w2) + b2)
        return dot(h, w3) + b3

    x1 = jnp.concatenate([e_l, e_r], axis=-1)
    g1 = mlp3(x1, w1a, b1a, w2a, b2a, w3a, b3a)
    nz = eps.shape[-1]
    eps_c = eps.astype(dot_dtype).astype(jnp.float32)   # kernel places eps via a dot
    z1 = g1[:, :nz] + jnp.exp(g1[:, nz:]) * eps_c
    x2 = jnp.concatenate([z1, e_l, e_r], axis=-1)
    g2 = mlp3(x2, w1b, b1b, w2b, b2b, w3b, b3b)
    return g1, z1, g2


# --------------------------------------------------------------------------- #
# Test
# --------------------------------------------------------------------------- #
if __name__ == "__main__":
    D_E, NZ, NZ_MID = 32, 16, 32

    key = jax.random.PRNGKey(0)
    params = init_params(jax.random.fold_in(key, 123), D_E, NZ, NZ_MID)

    def run_check(batch, dot_dtype, b_tile, tol):
        ks = jax.random.split(jax.random.fold_in(key, batch), 3)
        e_l = jax.random.normal(ks[0], (batch, D_E), jnp.float32)
        e_r = jax.random.normal(ks[1], (batch, D_E), jnp.float32)
        # eps plays the role of torch.randn_like() inside Gaussian.sample().
        eps = jax.random.normal(ks[2], (batch, NZ), jnp.float32)

        W, Bv = pack_params(params, D_E, NZ, NZ_MID, dot_dtype=dot_dtype)
        g1, z1, g2 = twolayer_prior_shared_pq(e_l, e_r, eps, W, Bv, b_tile=b_tile)
        jax.block_until_ready((g1, z1, g2))

        g1r, z1r, g2r = _reference(e_l, e_r, eps, params, dot_dtype=dot_dtype)
        assert jnp.allclose(g1, g1r, atol=tol, rtol=tol), f"g1 mismatch (B={batch})"
        assert jnp.allclose(z1, z1r, atol=tol, rtol=tol), f"z1 mismatch (B={batch})"
        assert jnp.allclose(g2, g2r, atol=tol, rtol=tol), f"g2 mismatch (B={batch})"

    # Tight f32 checks (layout / packing correctness): single step, multi-step,
    # explicit b_tile, and a non-multiple-of-8 batch (sublane padding path).
    run_check(batch=8, dot_dtype=jnp.float32, b_tile=None, tol=1e-4)
    run_check(batch=256, dot_dtype=jnp.float32, b_tile=None, tol=1e-4)
    run_check(batch=256, dot_dtype=jnp.float32, b_tile=64, tol=1e-4)
    run_check(batch=19, dot_dtype=jnp.float32, b_tile=None, tol=1e-4)
    # Default bf16 MXU operands (all generations), f32 accumulation + f32 elementwise.
    run_check(batch=64, dot_dtype=jnp.bfloat16, b_tile=None, tol=1e-2)

    print("KERNEL_OK")
</pallas_src>

<mosaic_0001>
module attributes {stable_mosaic.version = 11 : i64} {
  func.func @_twolayer_prior_kernel(%arg0: i32, %arg1: memref<8x32xf32, #tpu.memory_space<vmem>>, %arg2: memref<8x32xf32, #tpu.memory_space<vmem>>, %arg3: memref<8x16xf32, #tpu.memory_space<vmem>>, %arg4: memref<11x128x128xf32, #tpu.memory_space<vmem>>, %arg5: memref<7x1x128xf32, #tpu.memory_space<vmem>>, %arg6: memref<8x128xf32, #tpu.memory_space<vmem>>) attributes {dimension_semantics = [#tpu.dimension_semantics<parallel>], iteration_bounds = array<i64: 1>, scalar_prefetch = 0 : i64, scratch_operands = 0 : i64, tpu.core_type = #tpu.core_type<tc>, window_params = [{transform_indices = @transform_0, window_bounds = array<i64: 8, 32>}, {transform_indices = @transform_1, window_bounds = array<i64: 8, 32>}, {transform_indices = @transform_2, window_bounds = array<i64: 8, 16>}, {pipeline_mode = #tpu.pipeline_mode<synchronous>, transform_indices = @transform_3, window_bounds = array<i64: 11, 128, 128>}, {pipeline_mode = #tpu.pipeline_mode<synchronous>, transform_indices = @transform_4, window_bounds = array<i64: 7, 1, 128>}, {transform_indices = @transform_5, window_bounds = array<i64: 8, 128>}]} {
    %c0 = arith.constant 0 : index
    %c0_0 = arith.constant 0 : index
    %0 = vector.load %arg1[%c0, %c0_0] : memref<8x32xf32, #tpu.memory_space<vmem>>, vector<8x32xf32>
    %c0_1 = arith.constant 0 : index
    %c0_2 = arith.constant 0 : index
    %1 = vector.load %arg2[%c0_1, %c0_2] : memref<8x32xf32, #tpu.memory_space<vmem>>, vector<8x32xf32>
    %c0_3 = arith.constant 0 : index
    %c0_4 = arith.constant 0 : index
    %2 = vector.load %arg3[%c0_3, %c0_4] : memref<8x16xf32, #tpu.memory_space<vmem>>, vector<8x16xf32>
    %c0_5 = arith.constant 0 : index
    %c0_6 = arith.constant 0 : index
    %c0_7 = arith.constant 0 : index
    %3 = vector.load %arg4[%c0_5, %c0_6, %c0_7] : memref<11x128x128xf32, #tpu.memory_space<vmem>>, vector<1x32x128xf32>
    %4 = vector.shape_cast %3 : vector<1x32x128xf32> to vector<32x128xf32>
    %cst = arith.constant dense<0.000000e+00> : vector<8x128xf32>
    %5 = tpu.matmul %0, %4, %cst {dimension_numbers = #tpu.dot_dimension_numbers<[1], [0], [0], [1], [0, 0, 1, 1], [], []>} : vector<8x32xf32>, vector<32x128xf32>, vector<8x128xf32> -> vector<8x128xf32>
    %c1 = arith.constant 1 : index
    %c0_8 = arith.constant 0 : index
    %c0_9 = arith.constant 0 : index
    %6 = vector.load %arg4[%c1, %c0_8, %c0_9] : memref<11x128x128xf32, #tpu.memory_space<vmem>>, vector<1x32x128xf32>
    %7 = vector.shape_cast %6 : vector<1x32x128xf32> to vector<32x128xf32>
    %cst_10 = arith.constant dense<0.000000e+00> : vector<8x128xf32>
    %8 = tpu.matmul %1, %7, %cst_10 {dimension_numbers = #tpu.dot_dimension_numbers<[1], [0], [0], [1], [0, 0, 1, 1], [], []>} : vector<8x32xf32>, vector<32x128xf32>, vector<8x128xf32> -> vector<8x128xf32>
    %9 = arith.addf %5, %8 : vector<8x128xf32>
    %c0_11 = arith.constant 0 : index
    %c0_12 = arith.constant 0 : index
    %c0_13 = arith.constant 0 : index
    %10 = vector.load %arg5[%c0_11, %c0_12, %c0_13] : memref<7x1x128xf32, #tpu.memory_space<vmem>>, vector<1x1x128xf32>
    %11 = vector.shape_cast %10 : vector<1x1x128xf32> to vector<1x128xf32>
    %12 = vector.broadcast %11 : vector<1x128xf32> to vector<8x128xf32>
    %13 = arith.addf %9, %12 : vector<8x128xf32>
    %cst_14 = arith.constant 0.000000e+00 : f32
    %14 = vector.broadcast %cst_14 : f32 to vector<8x128xf32>
    %15 = arith.cmpf ogt, %13, %14 : vector<8x128xf32>
    %cst_15 = arith.constant 2.000000e-01 : f32
    %16 = vector.broadcast %cst_15 : f32 to vector<8x128xf32>
    %17 = arith.mulf %16, %13 : vector<8x128xf32>
    %18 = arith.select %15, %13, %17 : vector<8x128xi1>, vector<8x128xf32>
    %c2 = arith.constant 2 : index
    %c0_16 = arith.constant 0 : index
    %c0_17 = arith.constant 0 : index
    %19 = vector.load %arg4[%c2, %c0_16, %c0_17] : memref<11x128x128xf32, #tpu.memory_space<vmem>>, vector<1x128x128xf32>
    %20 = vector.shape_cast %19 : vector<1x128x128xf32> to vector<128x128xf32>
    %cst_18 = arith.constant dense<0.000000e+00> : vector<8x128xf32>
    %21 = tpu.matmul %18, %20, %cst_18 {dimension_numbers = #tpu.dot_dimension_numbers<[1], [0], [0], [1], [0, 0, 1, 1], [], []>} : vector<8x128xf32>, vector<128x128xf32>, vector<8x128xf32> -> vector<8x128xf32>
    %c1_19 = arith.constant 1 : index
    %c0_20 = arith.constant 0 : index
    %c0_21 = arith.constant 0 : index
    %22 = vector.load %arg5[%c1_19, %c0_20, %c0_21] : memref<7x1x128xf32, #tpu.memory_space<vmem>>, vector<1x1x128xf32>
    %23 = vector.shape_cast %22 : vector<1x1x128xf32> to vector<1x128xf32>
    %24 = vector.broadcast %23 : vector<1x128xf32> to vector<8x128xf32>
    %25 = arith.addf %21, %24 : vector<8x128xf32>
    %cst_22 = arith.constant 0.000000e+00 : f32
    %26 = vector.broadcast %cst_22 : f32 to vector<8x128xf32>
    %27 = arith.cmpf ogt, %25, %26 : vector<8x128xf32>
    %cst_23 = arith.constant 2.000000e-01 : f32
    %28 = vector.broadcast %cst_23 : f32 to vector<8x128xf32>
    %29 = arith.mulf %28, %25 : vector<8x128xf32>
    %30 = arith.select %27, %25, %29 : vector<8x128xi1>, vector<8x128xf32>
    %c3 = arith.constant 3 : index
    %c0_24 = arith.constant 0 : index
    %c0_25 = arith.constant 0 : index
    %31 = vector.load %arg4[%c3, %c0_24, %c0_25] : memref<11x128x128xf32, #tpu.memory_space<vmem>>, vector<1x128x128xf32>
    %32 = vector.shape_cast %31 : vector<1x128x128xf32> to vector<128x128xf32>
    %cst_26 = arith.constant dense<0.000000e+00> : vector<8x128xf32>
    %33 = tpu.matmul %30, %32, %cst_26 {dimension_numbers = #tpu.dot_dimension_numbers<[1], [0], [0], [1], [0, 0, 1, 1], [], []>} : vector<8x128xf32>, vector<128x128xf32>, vector<8x128xf32> -> vector<8x128xf32>
    %c2_27 = arith.constant 2 : index
    %c0_28 = arith.constant 0 : index
    %c0_29 = arith.constant 0 : index
    %34 = vector.load %arg5[%c2_27, %c0_28, %c0_29] : memref<7x1x128xf32, #tpu.memory_space<vmem>>, vector<1x1x128xf32>
    %35 = vector.shape_cast %34 : vector<1x1x128xf32> to vector<1x128xf32>
    %36 = vector.broadcast %35 : vector<1x128xf32> to vector<8x128xf32>
    %37 = arith.addf %33, %36 : vector<8x128xf32>
    %c4 = arith.constant 4 : index
    %c0_30 = arith.constant 0 : index
    %c0_31 = arith.constant 0 : index
    %38 = vector.load %arg4[%c4, %c0_30, %c0_31] : memref<11x128x128xf32, #tpu.memory_space<vmem>>, vector<1x128x128xf32>
    %39 = vector.shape_cast %38 : vector<1x128x128xf32> to vector<128x128xf32>
    %cst_32 = arith.constant dense<0.000000e+00> : vector<8x128xf32>
    %40 = tpu.matmul %30, %39, %cst_32 {dimension_numbers = #tpu.dot_dimension_numbers<[1], [0], [0], [1], [0, 0, 1, 1], [], []>} : vector<8x128xf32>, vector<128x128xf32>, vector<8x128xf32> -> vector<8x128xf32>
    %c3_33 = arith.constant 3 : index
    %c0_34 = arith.constant 0 : index
    %c0_35 = arith.constant 0 : index
    %41 = vector.load %arg5[%c3_33, %c0_34, %c0_35] : memref<7x1x128xf32, #tpu.memory_space<vmem>>, vector<1x1x128xf32>
    %42 = vector.shape_cast %41 : vector<1x1x128xf32> to vector<1x128xf32>
    %43 = vector.broadcast %42 : vector<1x128xf32> to vector<8x128xf32>
    %44 = arith.addf %40, %43 : vector<8x128xf32>
    %c5 = arith.constant 5 : index
    %c0_36 = arith.constant 0 : index
    %c0_37 = arith.constant 0 : index
    %45 = vector.load %arg4[%c5, %c0_36, %c0_37] : memref<11x128x128xf32, #tpu.memory_space<vmem>>, vector<1x16x128xf32>
    %46 = vector.shape_cast %45 : vector<1x16x128xf32> to vector<16x128xf32>
    %cst_38 = arith.constant dense<0.000000e+00> : vector<8x128xf32>
    %47 = tpu.matmul %2, %46, %cst_38 {dimension_numbers = #tpu.dot_dimension_numbers<[1], [0], [0], [1], [0, 0, 1, 1], [], []>} : vector<8x16xf32>, vector<16x128xf32>, vector<8x128xf32> -> vector<8x128xf32>
    %48 = tpu.iota {dimensions = array<i32: 1>} : vector<8x128xi32>
    %c32_i32 = arith.constant 32 : i32
    %49 = vector.broadcast %c32_i32 : i32 to vector<8x128xi32>
    %50 = arith.cmpi sge, %48, %49 : vector<8x128xi32>
    %c48_i32 = arith.constant 48 : i32
    %51 = vector.broadcast %c48_i32 : i32 to vector<8x128xi32>
    %52 = arith.cmpi slt, %48, %51 : vector<8x128xi32>
    %53 = arith.andi %50, %52 : vector<8x128xi1>
    %54 = math.exp %44 : vector<8x128xf32>
    %55 = arith.mulf %54, %47 : vector<8x128xf32>
    %56 = arith.select %53, %55, %44 : vector<8x128xi1>, vector<8x128xf32>
    %57 = arith.addf %37, %56 : vector<8x128xf32>
    %c6 = arith.constant 6 : index
    %c0_39 = arith.constant 0 : index
    %c0_40 = arith.constant 0 : index
    %58 = vector.load %arg4[%c6, %c0_39, %c0_40] : memref<11x128x128xf32, #tpu.memory_space<vmem>>, vector<1x128x128xf32>
    %59 = vector.shape_cast %58 : vector<1x128x128xf32> to vector<128x128xf32>
    %cst_41 = arith.constant dense<0.000000e+00> : vector<8x128xf32>
    %60 = tpu.matmul %57, %59, %cst_41 {dimension_numbers = #tpu.dot_dimension_numbers<[1], [0], [0], [1], [0, 0, 1, 1], [], []>} : vector<8x128xf32>, vector<128x128xf32>, vector<8x128xf32> -> vector<8x128xf32>
    %c7 = arith.constant 7 : index
    %c0_42 = arith.constant 0 : index
    %c0_43 = arith.constant 0 : index
    %61 = vector.load %arg4[%c7, %c0_42, %c0_43] : memref<11x128x128xf32, #tpu.memory_space<vmem>>, vector<1x32x128xf32>
    %62 = vector.shape_cast %61 : vector<1x32x128xf32> to vector<32x128xf32>
    %cst_44 = arith.constant dense<0.000000e+00> : vector<8x128xf32>
    %63 = tpu.matmul %0, %62, %cst_44 {dimension_numbers = #tpu.dot_dimension_numbers<[1], [0], [0], [1], [0, 0, 1, 1], [], []>} : vector<8x32xf32>, vector<32x128xf32>, vector<8x128xf32> -> vector<8x128xf32>
    %64 = arith.addf %60, %63 : vector<8x128xf32>
    %c8 = arith.constant 8 : index
    %c0_45 = arith.constant 0 : index
    %c0_46 = arith.constant 0 : index
    %65 = vector.load %arg4[%c8, %c0_45, %c0_46] : memref<11x128x128xf32, #tpu.memory_space<vmem>>, vector<1x32x128xf32>
    %66 = vector.shape_cast %65 : vector<1x32x128xf32> to vector<32x128xf32>
    %cst_47 = arith.constant dense<0.000000e+00> : vector<8x128xf32>
    %67 = tpu.matmul %1, %66, %cst_47 {dimension_numbers = #tpu.dot_dimension_numbers<[1], [0], [0], [1], [0, 0, 1, 1], [], []>} : vector<8x32xf32>, vector<32x128xf32>, vector<8x128xf32> -> vector<8x128xf32>
    %68 = arith.addf %64, %67 : vector<8x128xf32>
    %c4_48 = arith.constant 4 : index
    %c0_49 = arith.constant 0 : index
    %c0_50 = arith.constant 0 : index
    %69 = vector.load %arg5[%c4_48, %c0_49, %c0_50] : memref<7x1x128xf32, #tpu.memory_space<vmem>>, vector<1x1x128xf32>
    %70 = vector.shape_cast %69 : vector<1x1x128xf32> to vector<1x128xf32>
    %71 = vector.broadcast %70 : vector<1x128xf32> to vector<8x128xf32>
    %72 = arith.addf %68, %71 : vector<8x128xf32>
    %cst_51 = arith.constant 0.000000e+00 : f32
    %73 = vector.broadcast %cst_51 : f32 to vector<8x128xf32>
    %74 = arith.cmpf ogt, %72, %73 : vector<8x128xf32>
    %cst_52 = arith.constant 2.000000e-01 : f32
    %75 = vector.broadcast %cst_52 : f32 to vector<8x128xf32>
    %76 = arith.mulf %75, %72 : vector<8x128xf32>
    %77 = arith.select %74, %72, %76 : vector<8x128xi1>, vector<8x128xf32>
    %c9 = arith.constant 9 : index
    %c0_53 = arith.constant 0 : index
    %c0_54 = arith.constant 0 : index
    %78 = vector.load %arg4[%c9, %c0_53, %c0_54] : memref<11x128x128xf32, #tpu.memory_space<vmem>>, vector<1x128x128xf32>
    %79 = vector.shape_cast %78 : vector<1x128x128xf32> to vector<128x128xf32>
    %cst_55 = arith.constant dense<0.000000e+00> : vector<8x128xf32>
    %80 = tpu.matmul %77, %79, %cst_55 {dimension_numbers = #tpu.dot_dimension_numbers<[1], [0], [0], [1], [0, 0, 1, 1], [], []>} : vector<8x128xf32>, vector<128x128xf32>, vector<8x128xf32> -> vector<8x128xf32>
    %c5_56 = arith.constant 5 : index
    %c0_57 = arith.constant 0 : index
    %c0_58 = arith.constant 0 : index
    %81 = vector.load %arg5[%c5_56, %c0_57, %c0_58] : memref<7x1x128xf32, #tpu.memory_space<vmem>>, vector<1x1x128xf32>
    %82 = vector.shape_cast %81 : vector<1x1x128xf32> to vector<1x128xf32>
    %83 = vector.broadcast %82 : vector<1x128xf32> to vector<8x128xf32>
    %84 = arith.addf %80, %83 : vector<8x128xf32>
    %cst_59 = arith.constant 0.000000e+00 : f32
    %85 = vector.broadcast %cst_59 : f32 to vector<8x128xf32>
    %86 = arith.cmpf ogt, %84, %85 : vector<8x128xf32>
    %cst_60 = arith.constant 2.000000e-01 : f32
    %87 = vector.broadcast %cst_60 : f32 to vector<8x128xf32>
    %88 = arith.mulf %87, %84 : vector<8x128xf32>
    %89 = arith.select %86, %84, %88 : vector<8x128xi1>, vector<8x128xf32>
    %c10 = arith.constant 10 : index
    %c0_61 = arith.constant 0 : index
    %c0_62 = arith.constant 0 : index
    %90 = vector.load %arg4[%c10, %c0_61, %c0_62] : memref<11x128x128xf32, #tpu.memory_space<vmem>>, vector<1x128x128xf32>
    %91 = vector.shape_cast %90 : vector<1x128x128xf32> to vector<128x128xf32>
    %cst_63 = arith.constant dense<0.000000e+00> : vector<8x128xf32>
    %92 = tpu.matmul %89, %91, %cst_63 {dimension_numbers = #tpu.dot_dimension_numbers<[1], [0], [0], [1], [0, 0, 1, 1], [], []>} : vector<8x128xf32>, vector<128x128xf32>, vector<8x128xf32> -> vector<8x128xf32>
    %c6_64 = arith.constant 6 : index
    %c0_65 = arith.constant 0 : index
    %c0_66 = arith.constant 0 : index
    %93 = vector.load %arg5[%c6_64, %c0_65, %c0_66] : memref<7x1x128xf32, #tpu.memory_space<vmem>>, vector<1x1x128xf32>
    %94 = vector.shape_cast %93 : vector<1x1x128xf32> to vector<1x128xf32>
    %95 = vector.broadcast %94 : vector<1x128xf32> to vector<8x128xf32>
    %96 = arith.addf %92, %95 : vector<8x128xf32>
    %97 = arith.addf %57, %96 : vector<8x128xf32>
    %c0_67 = arith.constant 0 : index
    %c0_68 = arith.constant 0 : index
    %98 = vector.load %arg6[%c0_67, %c0_68] : memref<8x128xf32, #tpu.memory_space<vmem>>, vector<8x128xf32>
    tpu.vector_store %arg6[%c0_67, %c0_68], %97 {strides = array<i32>} : memref<8x128xf32, #tpu.memory_space<vmem>>, vector<8x128xf32>,
    return
  }
  func.func @transform_0(%arg0: i32) -> (i32, i32) {
    %c0_i32 = arith.constant 0 : i32
    %c0_i32_0 = arith.constant 0 : i32
    return %arg0, %c0_i32 : i32, i32
  }
  func.func @transform_1(%arg0: i32) -> (i32, i32) {
    %c0_i32 = arith.constant 0 : i32
    %c0_i32_0 = arith.constant 0 : i32
    return %arg0, %c0_i32 : i32, i32
  }
  func.func @transform_2(%arg0: i32) -> (i32, i32) {
    %c0_i32 = arith.constant 0 : i32
    %c0_i32_0 = arith.constant 0 : i32
    return %arg0, %c0_i32 : i32, i32
  }
  func.func @transform_3(%arg0: i32) -> (i32, i32, i32) {
    %c0_i32 = arith.constant 0 : i32
    %c0_i32_0 = arith.constant 0 : i32
    %c0_i32_1 = arith.constant 0 : i32
    %c0_i32_2 = arith.constant 0 : i32
    return %c0_i32, %c0_i32_0, %c0_i32_1 : i32, i32, i32
  }
  func.func @transform_4(%arg0: i32) -> (i32, i32, i32) {
    %c0_i32 = arith.constant 0 : i32
    %c0_i32_0 = arith.constant 0 : i32
    %c0_i32_1 = arith.constant 0 : i32
    %c0_i32_2 = arith.constant 0 : i32
    return %c0_i32, %c0_i32_0, %c0_i32_1 : i32, i32, i32
  }
  func.func @transform_5(%arg0: i32) -> (i32, i32) {
    %c0_i32 = arith.constant 0 : i32
    %c0_i32_0 = arith.constant 0 : i32
    return %arg0, %c0_i32 : i32, i32
  }
}

</mosaic_0001>

<bundles_post_ra>
// kernel: tpu_custom_call.1
= control target key start
LH: loop header
LB: loop body
LE: loop exit
PB: predicated region body
PF: predicated region fallthrough
CT: control target
= control target key end

     0   :  { %10 = vsyncpa [#allocation3], 0  ;;  %s2005_s0 = inlined_call_operand.hbm [shape: f32[8,32], index: 0, kind: input, shape index: {}]   ;;  %s2006_s1 = inlined_call_operand.hbm [shape: f32[8,32], index: 1, kind: input, shape index: {}]   ;;  %s2007_s2 = inlined_call_operand.hbm [shape: f32[8,16], index: 2, kind: input, shape index: {}]   ;;  %s2008_s3 = inlined_call_operand.hbm [shape: f32[11,128,128], index: 3, kind: input, shape index: {}]   ;;  %s2009_s4 = inlined_call_operand.vmem [shape: f32[7,1,128], index: 4, kind: input, shape index: {}]   ;;  %s2010_s5 = inlined_call_operand.hbm [shape: f32[8,128], index: 5, kind: output, shape index: {}]  }
   0x1   :  { %11 = vsyncpa [#allocation6], 0 }
   0x2   :  { %12 = vsyncpa [#allocation9], 0 }
   0x3   :  { %13 = vsyncpa [#allocation4], 0  ;;  %s1782_s18 = smov [#allocation5]   ;;  %s1783_s20 = smov [#allocation2]  }
   0x4   :  { %s30_s19 = sshll.u32 %s1782_s18, 4  ;;  %s20_s21 = sshll.u32 %s1783_s20, 4  ;;  %s31_s19 = int_to_ptr.vmem [resolvable:$true] %s30_s19  ;;  %s21_s21 = int_to_ptr.vmem [resolvable:$true] %s20_s21 }
   0x5   :  { %s1664_s24 = scalar_lea.hbm %s2006_s1, 128 }
   0x6   :  { %p1665_p0 = scmp.ne.s32.totalorder %s2006_s1, %s1664_s24  ;;  %p1668_p1 = scmp.lt.u32.totalorder %s1664_s24, %s2006_s1 }
   0x8   :  { %p1670_p2 = pnand %p1668_p1, %p1665_p0 }
   0xa   :  { %1673 = shalt.err (!%p1670_p2)
}
   0xb   :  { %s1674_s29 = scalar_lea.vmem %s31_s19, 128  ;;  %p1679_p4 = scmp.lt.s32.totalorder %s31_s19, %s31_s19 }
   0xc   :  { %p1675_p3 = scmp.ne.s32.totalorder %s31_s19, %s1674_s29  ;;  %p1680_p5 = scmp.lt.s32.totalorder %s1674_s29, %s1674_s29 }
   0xe   :  { %p1681_p6 = por %p1680_p5, %p1679_p4 }
  0x10   :  { %p1682_p7 = pnand %p1681_p6, %p1675_p3 }
  0x12   :  { %1685 = shalt.err (!%p1682_p7)
}
  0x13   :  { %33 = dma.hbm_to_vmem [thread:$0]  %s2006_s1, 128, %s31_s19, [#allocation6]  }
  0x14   :  { %s1686_s9 = scalar_lea.hbm %s2005_s0, 128 }
  0x15   :  { %p1687_p8 = scmp.ne.s32.totalorder %s2005_s0, %s1686_s9  ;;  %p1690_p9 = scmp.lt.u32.totalorder %s1686_s9, %s2005_s0 }
  0x17   :  { %p1692_p10 = pnand %p1690_p9, %p1687_p8 }
  0x19   :  { %1695 = shalt.err (!%p1692_p10)
}
  0x1a   :  { %s1696_s14 = scalar_lea.vmem %s21_s21, 128  ;;  %p1701_p12 = scmp.lt.s32.totalorder %s21_s21, %s21_s21 }
  0x1b   :  { %p1697_p11 = scmp.ne.s32.totalorder %s21_s21, %s1696_s14  ;;  %p1702_p13 = scmp.lt.s32.totalorder %s1696_s14, %s1696_s14 }
  0x1d   :  { %p1703_p0 = por %p1702_p13, %p1701_p12 }
  0x1f   :  { %p1704_p1 = pnand %p1703_p0, %p1697_p11 }
  0x21   :  { %1707 = shalt.err (!%p1704_p1)
}
  0x22   :  { %23 = dma.hbm_to_vmem [thread:$0]  %s2005_s0, 128, %s21_s21, [#allocation3]  }
  0x23   :  { %s1784_s16 = smov [#allocation7]   ;;  %s1785_s18 = smov [#allocation8]  }
  0x24   :  { %s40_s17 = sshll.u32 %s1784_s16, 4  ;;  %s49_s19 = sshll.u32 %s1785_s18, 4  ;;  %s41_s17 = int_to_ptr.vmem [resolvable:$true] %s40_s17  ;;  %s1846_s19 = int_to_ptr.vmem [resolvable:$true] %s49_s19 }
  0x25   :  { %s1708_s23 = scalar_lea.hbm %s2007_s2, 128 }
  0x26   :  { %p1709_p2 = scmp.ne.s32.totalorder %s2007_s2, %s1708_s23  ;;  %p1712_p3 = scmp.lt.u32.totalorder %s1708_s23, %s2007_s2 }
  0x28   :  { %p1714_p4 = pnand %p1712_p3, %p1709_p2 }
  0x2a   :  { %1717 = shalt.err (!%p1714_p4)
}
  0x2b   :  { %s1718_s0 = scalar_lea.vmem %s41_s17, 128  ;;  %p1723_p6 = scmp.lt.s32.totalorder %s41_s17, %s41_s17 }
  0x2c   :  { %p1719_p5 = scmp.ne.s32.totalorder %s41_s17, %s1718_s0  ;;  %p1724_p7 = scmp.lt.s32.totalorder %s1718_s0, %s1718_s0 }
  0x2e   :  { %p1725_p8 = por %p1724_p7, %p1723_p6 }
  0x30   :  { %p1726_p9 = pnand %p1725_p8, %p1719_p5 }
  0x32   :  { %1729 = shalt.err (!%p1726_p9)
}
  0x33   :  { %43 = dma.hbm_to_vmem [thread:$0]  %s2007_s2, 128, %s41_s17, [#allocation6]  }
  0x34   :  { %s1730_s6 = scalar_lea.hbm %s2008_s3, 22528 }
  0x35   :  { %p1731_p10 = scmp.ne.s32.totalorder %s2008_s3, %s1730_s6  ;;  %p1734_p11 = scmp.lt.u32.totalorder %s1730_s6, %s2008_s3 }
  0x37   :  { %p1736_p12 = pnand %p1734_p11, %p1731_p10 }
  0x39   :  { %1739 = shalt.err (!%p1736_p12)
}
  0x3a   :  { %s1740_s11 = scalar_lea.vmem %s1846_s19, 22528  ;;  %p1745_p0 = scmp.lt.s32.totalorder %s1846_s19, %s1846_s19 }
  0x3b   :  { %p1741_p13 = scmp.ne.s32.totalorder %s1846_s19, %s1740_s11  ;;  %p1746_p1 = scmp.lt.s32.totalorder %s1740_s11, %s1740_s11 }
  0x3d   :  { %p1747_p2 = por %p1746_p1, %p1745_p0 }
  0x3f   :  { %p1748_p3 = pnand %p1747_p2, %p1741_p13 }
  0x41   :  { %1751 = shalt.err (!%p1748_p3)
}
  0x42   :  { %s1786_s2 = smov 128   ;;  %s1787_s12 = smov 8  }
  0x43   :  { %55 = dma.hbm_to_vmem [thread:$0]  %s2008_s3, 22528, %s1846_s19, [#allocation9], %s1786_s2, %s1786_s2, %s1787_s12  }
  0x44   :  { %1774 = dma.done.wait [#allocation3], 128  }
  0x45   :  { %1775 = vsyncadd [#allocation3], 4294967168 }
  0x46   :  { %1776 = dma.done.wait [#allocation6], 256  }
  0x47   :  { %1777 = vsyncadd [#allocation6], 4294967040 }
  0x48   :  { %1778 = dma.done.wait [#allocation9], 22528  }
  0x49   :  { %1779 = vsyncadd [#allocation9], 4294944768  ;;  %v1788_v0 = vmov 0.0|0.0   ;;  %vm1789_vm0 = vmmov 0   ;;  %v1790_v1 = vmov 0.0   ;;  %v78_v2 = vld [vmem:[#allocation8 + $0x80] sm:$0xff] }
  0x4a   :  { %1481 = vmatprep.subr.bf16.mxu0 %v1788_v0  ;;  %1487 = vmatprep.subr.bf16.mxu1 %v1788_v0  ;;  %v79_v3 = vld [vmem:[#allocation8 + $0x88] sm:$0xff]  ;;  %v73_v4 = vld [vmem:[#allocation8] sm:$0xff]  ;;  %v80_v7 = vld [vmem:[#allocation8 + $0x90] sm:$0xff]  ;;  %vm82_vm1 = vcmask 261120   ;;  %vm531_vm4 = vcmask 130048   ;;  %s1791_s0 = smov [#allocation10]  }
  0x4b   :  { %1228 = vmatprep.mubr.msk.f32.mxu0 %vm1789_vm0, %v1790_v1  ;;  %1239 = vmatprep.mubr.msk.f32.mxu1 %vm1789_vm0, %v1790_v1  ;;  %v1482_v5 = vpack.c.bf16 %v79_v3, %v78_v2  ;;  %v74_v6 = vld [vmem:[#allocation8 + $0x8] sm:$0xff]  ;;  %v81_v8 = vld [vmem:[#allocation8 + $0x98] sm:$0xff]  ;;  %v75_v10 = vld [vmem:[#allocation8 + $0x10] sm:$0xff]  ;;  %s1066_s21 = sshll.u32 %s1791_s0, 4  ;;  %s1067_s21 = int_to_ptr.vmem [resolvable:$true] %s1066_s21 }
  0x4c   :  { %v1488_v9 = vpack.c.bf16 %v74_v6, %v73_v4  ;;  %v76_v11 = vld [vmem:[#allocation8 + $0x18] sm:$0xff]  ;;  %v1485_v12 = vpack.c.bf16 %v81_v8, %v80_v7  ;;  %v241_v14 = vld [vmem:[#allocation8 + $0x100] sm:$0xff]  ;;  %v242_v15 = vld [vmem:[#allocation8 + $0x108] sm:$0xff]  ;;  %s1752_s28 = scalar_lea.vmem %s1067_s21, 128  ;;  %p1757_p5 = scmp.lt.s32.totalorder %s1067_s21, %s1067_s21 }
  0x4d   :  { %1483 = vmatpush3.bf16.msra.mxu0 %v1482_v5  ;;  %v1491_v13 = vpack.c.bf16 %v76_v11, %v75_v10  ;;  %v1885_v16 = vld [vmem:[#allocation5] sm:$0xff]  ;;  %v1494_v17 = vpack.c.bf16 %v242_v15, %v241_v14  ;;  %v1887_v18 = vld [vmem:[#allocation2] sm:$0xff]  ;;  %v244_v20 = vld [vmem:[#allocation8 + $0x118] sm:$0xff]  ;;  %p1753_p4 = scmp.ne.s32.totalorder %s1067_s21, %s1752_s28  ;;  %p1758_p6 = scmp.lt.s32.totalorder %s1752_s28, %s1752_s28 }
  0x4e   :  { %1489 = vmatpush3.bf16.msra.mxu1 %v1488_v9  ;;  %1484 = vmatprep.subr.bf16.mxu0 %v1788_v0  ;;  %v243_v19 = vld [vmem:[#allocation8 + $0x110] sm:$0xff]  ;;  %v245_v22 = vld [vmem:[#allocation8 + $0x120] sm:$0xff]  ;;  %v246_v23 = vld [vmem:[#allocation8 + $0x128] sm:$0xff] }
  0x4f   :  { %1490 = vmatprep.subr.bf16.mxu1 %v1788_v0  ;;  %v1497_v21 = vpack.c.bf16 %v244_v20, %v243_v19  ;;  %v1500_v24 = vpack.c.bf16 %v246_v23, %v245_v22  ;;  %v247_v25 = vld [vmem:[#allocation8 + $0x130] sm:$0xff]  ;;  %v248_v26 = vld [vmem:[#allocation8 + $0x138] sm:$0xff]  ;;  %v249_v28 = vld [vmem:[#allocation8 + $0x140] sm:$0xff]  ;;  %p1759_p7 = por %p1758_p6, %p1757_p5 }
  0x50   :  { %v1503_v27 = vpack.c.bf16 %v248_v26, %v247_v25  ;;  %v250_v29 = vld [vmem:[#allocation8 + $0x148] sm:$0xff]  ;;  %v251_v31 = vld [vmem:[#allocation8 + $0x150] sm:$0xff]  ;;  %v252_v32 = vld [vmem:[#allocation8 + $0x158] sm:$0xff] }
  0x51   :  { %1486 = vmatpush3.bf16.msra.mxu0 %v1485_v12  ;;  %v1506_v30 = vpack.c.bf16 %v250_v29, %v249_v28  ;;  %v1509_v33 = vpack.c.bf16 %v252_v32, %v251_v31  ;;  %v253_v34 = vld [vmem:[#allocation8 + $0x160] sm:$0xff]  ;;  %v254_v35 = vld [vmem:[#allocation8 + $0x168] sm:$0xff]  ;;  %v255_v37 = vld [vmem:[#allocation8 + $0x170] sm:$0xff]  ;;  %p1760_p8 = pnand %p1759_p7, %p1753_p4 }
  0x52   :  { %1492 = vmatpush3.bf16.msra.mxu1 %v1491_v13  ;;  %1493 = vmatprep.subr.bf16.mxu0 %v1788_v0  ;;  %v1512_v36 = vpack.c.bf16 %v254_v35, %v253_v34  ;;  %v256_v38 = vld [vmem:[#allocation8 + $0x178] sm:$0xff]  ;;  %v339_v40 = vld [vmem:[#allocation8 + $0x180] sm:$0xff]  ;;  %v340_v41 = vld [vmem:[#allocation8 + $0x188] sm:$0xff] }
  0x53   :  { %1517 = vmatprep.subr.bf16.mxu1 %v1788_v0  ;;  %v1515_v39 = vpack.c.bf16 %v256_v38, %v255_v37  ;;  %v1518_v42 = vpack.c.bf16 %v340_v41, %v339_v40  ;;  %v341_v43 = vld [vmem:[#allocation8 + $0x190] sm:$0xff]  ;;  %v342_v44 = vld [vmem:[#allocation8 + $0x198] sm:$0xff]  ;;  %v343_v46 = vld [vmem:[#allocation8 + $0x1a0] sm:$0xff] }
  0x54   :  { %1229 = vmatmul.mubr.msk.f32.vlgmr.msra.gmra.mrb[0].mxu0 %vm82_vm1, %v1885_v16  ;;  %v1521_v45 = vpack.c.bf16 %v342_v44, %v341_v43  ;;  %v344_v47 = vld [vmem:[#allocation8 + $0x1a8] sm:$0xff]  ;;  %v345_v49 = vld [vmem:[#allocation8 + $0x1b0] sm:$0xff]  ;;  %v346_v50 = vld [vmem:[#allocation8 + $0x1b8] sm:$0xff] }
  0x55   :  { %1240 = vmatmul.mubr.msk.f32.vlgmr.msra.gmra.mrb[0].mxu1 %vm82_vm1, %v1887_v18  ;;  %1495 = vmatpush3.bf16.msra.mxu0 %v1494_v17  ;;  %v1524_v48 = vpack.c.bf16 %v344_v47, %v343_v46  ;;  %v1527_v51 = vpack.c.bf16 %v346_v50, %v345_v49  ;;  %v347_v52 = vld [vmem:[#allocation8 + $0x1c0] sm:$0xff]  ;;  %v348_v53 = vld [vmem:[#allocation8 + $0x1c8] sm:$0xff]  ;;  %v349_v55 = vld [vmem:[#allocation8 + $0x1d0] sm:$0xff] }
  0x56   :  { %1496 = vmatprep.subr.bf16.mxu0 %v1788_v0  ;;  %1274 = vmatprep.mubr.msk.f32.mxu0 %vm1789_vm0, %v1790_v1  ;;  %v1530_v54 = vpack.c.bf16 %v348_v53, %v347_v52  ;;  %v350_v56 = vld [vmem:[#allocation8 + $0x1d8] sm:$0xff]  ;;  %v351_v58 = vld [vmem:[#allocation8 + $0x1e0] sm:$0xff]  ;;  %v352_v59 = vld [vmem:[#allocation8 + $0x1e8] sm:$0xff] }
  0x57   :  { %1309 = vmatprep.mubr.msk.f32.mxu1 %vm1789_vm0, %v1790_v1  ;;  %1519 = vmatpush3.bf16.msra.mxu1 %v1518_v42  ;;  %v1533_v57 = vpack.c.bf16 %v350_v56, %v349_v55  ;;  %v1536_v60 = vpack.c.bf16 %v352_v59, %v351_v58  ;;  %v1079_v63 = vld [vmem:[%s2009_s4] ss:$0 sm:$0xff]  ;;  %v434_v5 = vld [vmem:[#allocation8 + $0x200] sm:$0xff]  ;;  %v436_v10 = vld [vmem:[#allocation8 + $0x210] sm:$0xff] }
  0x58   :  { %1520 = vmatprep.subr.bf16.mxu1 %v1788_v0  ;;  %v435_v6 = vld [vmem:[#allocation8 + $0x208] sm:$0xff]  ;;  %v437_v11 = vld [vmem:[#allocation8 + $0x218] sm:$0xff]  ;;  %v438_v14 = vld [vmem:[#allocation8 + $0x220] sm:$0xff] }
  0x59   :  { %1498 = vmatpush3.bf16.msra.mxu0 %v1497_v21  ;;  %v1542_v9 = vpack.c.bf16 %v435_v6, %v434_v5  ;;  %v1545_v13 = vpack.c.bf16 %v437_v11, %v436_v10  ;;  %v439_v15 = vld [vmem:[#allocation8 + $0x228] sm:$0xff]  ;;  %v440_v19 = vld [vmem:[#allocation8 + $0x230] sm:$0xff]  ;;  %v441_v20 = vld [vmem:[#allocation8 + $0x238] sm:$0xff] }
  0x5a   :  { %1499 = vmatprep.subr.bf16.mxu0 %v1788_v0  ;;  %v1548_v17 = vpack.c.bf16 %v439_v15, %v438_v14  ;;  %v1551_v21 = vpack.c.bf16 %v441_v20, %v440_v19  ;;  %v442_v22 = vld [vmem:[#allocation8 + $0x240] sm:$0xff]  ;;  %v443_v23 = vld [vmem:[#allocation8 + $0x248] sm:$0xff]  ;;  %v444_v25 = vld [vmem:[#allocation8 + $0x250] sm:$0xff] }
  0x5b   :  { %1522 = vmatpush3.bf16.msra.mxu1 %v1521_v45  ;;  %v445_v26 = vld [vmem:[#allocation8 + $0x258] sm:$0xff]  ;;  %v446_v28 = vld [vmem:[#allocation8 + $0x260] sm:$0xff]  ;;  %v447_v29 = vld [vmem:[#allocation8 + $0x268] sm:$0xff] }
  0x5c   :  { %1523 = vmatprep.subr.bf16.mxu1 %v1788_v0  ;;  %v353_v31 = vld [vmem:[#allocation8 + $0x1f0] sm:$0xff]  ;;  %v354_v32 = vld [vmem:[#allocation8 + $0x1f8] sm:$0xff]  ;;  %v1081_v37 = vld [vmem:[%s2009_s4 + $0x1] ss:$0 sm:$0xff] }
  0x5d   :  { %1501 = vmatpush3.bf16.msra.mxu0 %v1500_v24  ;;  %v1554_v24 = vpack.c.bf16 %v443_v23, %v442_v22  ;;  %v1539_v34 = vpack.c.bf16 %v354_v32, %v353_v31  ;;  %v449_v35 = vld [vmem:[#allocation8 + $0x278] sm:$0xff]  ;;  %v530_v40 = vld [vmem:[#allocation8 + $0x288] sm:$0xff]  ;;  %v633_v45 = vld [vmem:[#allocation8 + $0x380] sm:$0xff] }
  0x5e   :  { %1502 = vmatprep.subr.bf16.mxu0 %v1788_v0  ;;  %v634_v46 = vld [vmem:[#allocation8 + $0x388] sm:$0xff]  ;;  %v635_v50 = vld [vmem:[#allocation8 + $0x390] sm:$0xff]  ;;  %v616_v53 = vld [vmem:[#allocation8 + $0x300] sm:$0xff] }
  0x5f   :  { %1525 = vmatpush3.bf16.msra.mxu1 %v1524_v48  ;;  %v72_v48 = vld [vmem:[#allocation7] sm:$0xff]  ;;  %v1569_v49 = vpack.c.bf16 %v634_v46, %v633_v45  ;;  %v618_v56 = vld [vmem:[#allocation8 + $0x310] sm:$0xff]  ;;  %v620_v59 = vld [vmem:[#allocation8 + $0x320] sm:$0xff] }
  0x60   :  { %1526 = vmatprep.subr.bf16.mxu1 %v1788_v0  ;;  %v626_v5 = vld [vmem:[#allocation8 + $0x350] sm:$0xff]  ;;  %v627_v6 = vld [vmem:[#allocation8 + $0x358] sm:$0xff]  ;;  %v778_v11 = vld [vmem:[#allocation8 + $0x400] sm:$0xff] }
  0x61   :  { %1504 = vmatpush3.bf16.msra.mxu0 %v1503_v27  ;;  %v1557_v27 = vpack.c.bf16 %v445_v26, %v444_v25  ;;  %v630_v14 = vld [vmem:[#allocation8 + $0x370] sm:$0xff]  ;;  %v631_v15 = vld [vmem:[#allocation8 + $0x378] sm:$0xff]  ;;  %v866_v22 = vld [vmem:[#allocation8 + $0x480] sm:$0xff] }
  0x62   :  { %1505 = vmatprep.subr.bf16.mxu0 %v1788_v0  ;;  %v780_v19 = vld [vmem:[#allocation8 + $0x410] sm:$0xff]  ;;  %v781_v20 = vld [vmem:[#allocation8 + $0x418] sm:$0xff]  ;;  %v867_v23 = vld [vmem:[#allocation8 + $0x488] sm:$0xff] }
  0x63   :  { %1528 = vmatpush3.bf16.msra.mxu1 %v1527_v51  ;;  %v636_v51 = vld [vmem:[#allocation8 + $0x398] sm:$0xff]  ;;  %v1605_v25 = vpack.c.bf16 %v867_v23, %v866_v22  ;;  %v872_v31 = vld [vmem:[#allocation8 + $0x4b0] sm:$0xff]  ;;  %v976_v22 = vld [vmem:[#allocation8 + $0x560] sm:$0xff] }
  0x64   :  { %1529 = vmatprep.subr.bf16.mxu1 %v1788_v0  ;;  %v1572_v52 = vpack.c.bf16 %v636_v51, %v635_v50  ;;  %v869_v26 = vld [vmem:[#allocation8 + $0x498] sm:$0xff]  ;;  %v977_v23 = vld [vmem:[#allocation8 + $0x568] sm:$0xff] }
  0x65   :  { %1507 = vmatpush3.bf16.msra.mxu0 %v1506_v30  ;;  %v1560_v30 = vpack.c.bf16 %v447_v29, %v446_v28  ;;  %v870_v28 = vld [vmem:[#allocation8 + $0x4a0] sm:$0xff]  ;;  %v871_v29 = vld [vmem:[#allocation8 + $0x4a8] sm:$0xff]  ;;  %v873_v32 = vld [vmem:[#allocation8 + $0x4b8] sm:$0xff] }
  0x66   :  { %1508 = vmatprep.subr.bf16.mxu0 %v1788_v0 }
  0x67   :  { %1531 = vmatpush3.bf16.msra.mxu1 %v1530_v54  ;;  %v617_v54 = vld [vmem:[#allocation8 + $0x308] sm:$0xff] }
  0x68   :  { %1532 = vmatprep.subr.bf16.mxu1 %v1788_v0  ;;  %v1575_v55 = vpack.c.bf16 %v617_v54, %v616_v53 }
  0x69   :  { %1510 = vmatpush3.bf16.msra.mxu0 %v1509_v33  ;;  %v448_v33 = vld [vmem:[#allocation8 + $0x270] sm:$0xff] }
  0x6a   :  { %1511 = vmatprep.subr.bf16.mxu0 %v1788_v0 }
  0x6b   :  { %1534 = vmatpush3.bf16.msra.mxu1 %v1533_v57  ;;  %v619_v57 = vld [vmem:[#allocation8 + $0x318] sm:$0xff] }
  0x6c   :  { %1535 = vmatprep.subr.bf16.mxu1 %v1788_v0  ;;  %v1578_v58 = vpack.c.bf16 %v619_v57, %v618_v56 }
  0x6d   :  { %1513 = vmatpush3.bf16.msra.mxu0 %v1512_v36  ;;  %v1563_v36 = vpack.c.bf16 %v449_v35, %v448_v33  ;;  %v1614_v33 = vpack.c.bf16 %v873_v32, %v872_v31 }
  0x6e   :  { %1514 = vmatprep.subr.bf16.mxu0 %v1788_v0 }
  0x6f   :  { %1537 = vmatpush3.bf16.msra.mxu1 %v1536_v60  ;;  %v621_v60 = vld [vmem:[#allocation8 + $0x328] sm:$0xff] }
  0x70   :  { %1538 = vmatprep.subr.bf16.mxu1 %v1788_v0 }
  0x71   :  { %1516 = vmatpush3.bf16.msra.mxu0 %v1515_v39  ;;  %v529_v39 = vld [vmem:[#allocation8 + $0x280] sm:$0xff] }
  0x72   :  { %1541 = vmatprep.subr.bf16.mxu0 %v1788_v0  ;;  %v1566_v44 = vpack.c.bf16 %v530_v40, %v529_v39  ;;  %v1085_v39 = vld [vmem:[%s2009_s4 + $0x3] ss:$0 sm:$0xff] }
  0x73   :  { %1540 = vmatpush3.bf16.msra.mxu1 %v1539_v34  ;;  %v875_v34 = vld [vmem:[#allocation8 + $0x4c8] sm:$0xff] }
  0x74   :  { %1565 = vmatprep.subr.bf16.mxu1 %v1788_v0 }
 0x127   :  { %v152_v61 = vpop.f32.mrb[0].mxu0 }
 0x128   :  { %v225_v62 = vpop.f32.mrb[0].mxu1  ;;  %v1230_v2 = vpop.f32.mrb[1].mxu0 }
 0x129   :  { %v226_v3 = vadd.f32 %v225_v62, %v152_v61  ;;  %v1241_v4 = vpop.f32.mrb[1].mxu1  ;;  %v1581_v61 = vpack.c.bf16 %v621_v60, %v620_v59  ;;  %v622_v62 = vld [vmem:[#allocation8 + $0x330] sm:$0xff]  ;;  %v879_v59 = vld [vmem:[#allocation8 + $0x4e8] sm:$0xff] }
 0x12b   :  { %v236_v7 = vadd.f32 %v1079_v63, %v226_v3  ;;  %v623_v63 = vld [vmem:[#allocation8 + $0x338] sm:$0xff]  ;;  %v625_v3 = vld [vmem:[#allocation8 + $0x348] sm:$0xff] }
 0x12c   :  { %v1584_v2 = vpack.c.bf16 %v623_v63, %v622_v62  ;;  %v880_v63 = vld [vmem:[#allocation8 + $0x4f0] sm:$0xff] }
 0x12d   :  { %v238_v8 = vmul.f32 0.2, %v236_v7  ;;  %vm237_vm2 = vcmp.gt.f32.partialorder %v236_v7, 0.0 }
 0x12f   :  { %v239_v12 = vsel %vm237_vm2, %v236_v7, %v238_v8  ;;  %v1590_v7 = vpack.c.bf16 %v627_v6, %v626_v5  ;;  %v628_v8 = vld [vmem:[#allocation8 + $0x360] sm:$0xff]  ;;  %v966_v5 = vld [vmem:[#allocation8 + $0x510] sm:$0xff] }
 0x130   :  { %1275 = vmatmul.mubr.f32.vlgmr.msra.gmra.mrb[2].mxu0 %v239_v12  ;;  %v779_v12 = vld [vmem:[#allocation8 + $0x408] sm:$0xff] }
 0x131   :  { %1543 = vmatpush3.bf16.msra.mxu0 %v1542_v9  ;;  %1344 = vmatprep.mubr.msk.f32.mxu0 %vm1789_vm0, %v1790_v1  ;;  %v629_v9 = vld [vmem:[#allocation8 + $0x368] sm:$0xff] }
 0x132   :  { %1544 = vmatprep.subr.bf16.mxu0 %v1788_v0  ;;  %v1593_v10 = vpack.c.bf16 %v629_v9, %v628_v8  ;;  %v969_v9 = vld [vmem:[#allocation8 + $0x528] sm:$0xff] }
 0x135   :  { %1546 = vmatpush3.bf16.msra.mxu0 %v1545_v13  ;;  %v1599_v13 = vpack.c.bf16 %v779_v12, %v778_v11  ;;  %v970_v11 = vld [vmem:[#allocation8 + $0x530] sm:$0xff]  ;;  %v971_v12 = vld [vmem:[#allocation8 + $0x538] sm:$0xff] }
 0x136   :  { %1547 = vmatprep.subr.bf16.mxu0 %v1788_v0 }
 0x139   :  { %1549 = vmatpush3.bf16.msra.mxu0 %v1548_v17  ;;  %v1596_v17 = vpack.c.bf16 %v631_v15, %v630_v14  ;;  %v972_v14 = vld [vmem:[#allocation8 + $0x540] sm:$0xff]  ;;  %v973_v15 = vld [vmem:[#allocation8 + $0x548] sm:$0xff] }
 0x13a   :  { %1550 = vmatprep.subr.bf16.mxu0 %v1788_v0 }
 0x13d   :  { %1552 = vmatpush3.bf16.msra.mxu0 %v1551_v21  ;;  %v1602_v21 = vpack.c.bf16 %v781_v20, %v780_v19  ;;  %v974_v19 = vld [vmem:[#allocation8 + $0x550] sm:$0xff]  ;;  %v975_v20 = vld [vmem:[#allocation8 + $0x558] sm:$0xff] }
 0x13e   :  { %1553 = vmatprep.subr.bf16.mxu0 %v1788_v0 }
 0x141   :  { %1555 = vmatpush3.bf16.msra.mxu0 %v1554_v24  ;;  %v868_v24 = vld [vmem:[#allocation8 + $0x490] sm:$0xff] }
 0x142   :  { %1556 = vmatprep.subr.bf16.mxu0 %v1788_v0 }
 0x145   :  { %1558 = vmatpush3.bf16.msra.mxu0 %v1557_v27  ;;  %v1608_v27 = vpack.c.bf16 %v869_v26, %v868_v24  ;;  %v1647_v24 = vpack.c.bf16 %v977_v23, %v976_v22 }
 0x146   :  { %1559 = vmatprep.subr.bf16.mxu0 %v1788_v0 }
 0x149   :  { %1561 = vmatpush3.bf16.msra.mxu0 %v1560_v30  ;;  %v1611_v30 = vpack.c.bf16 %v871_v29, %v870_v28  ;;  %v1090_v28 = vld [vmem:[%s2009_s4 + $0x4] ss:$0 sm:$0xff] }
 0x14a   :  { %1562 = vmatprep.subr.bf16.mxu0 %v1788_v0 }
 0x14d   :  { %1564 = vmatpush3.bf16.msra.mxu0 %v1563_v36  ;;  %v876_v36 = vld [vmem:[#allocation8 + $0x4d0] sm:$0xff] }
 0x14e   :  { %1598 = vmatprep.subr.bf16.mxu0 %v1788_v0 }
 0x203   :  { %v331_v38 = vpop.f32.mrb[2].mxu0 }
 0x204   :  { %v332_v41 = vadd.f32 %v1081_v37, %v331_v38  ;;  %v1276_v42 = vpop.f32.mrb[3].mxu0  ;;  %v877_v37 = vld [vmem:[#allocation8 + $0x4d8] sm:$0xff] }
 0x205   :  { %v1620_v38 = vpack.c.bf16 %v877_v37, %v876_v36 }
 0x206   :  { %vm335_vm3 = vcmp.gt.f32.partialorder %v332_v41, 0.0  ;;  %v336_v43 = vmul.f32 0.2, %v332_v41 }
 0x208   :  { %v337_v47 = vsel %vm335_vm3, %v332_v41, %v336_v43 }
 0x209   :  { %1310 = vmatmul.mubr.f32.vlgmr.msra.gmra.mrb[2].mxu1 %v337_v47  ;;  %1345 = vmatmul.mubr.f32.vlgmr.msra.gmra.mrb[4].mxu0 %v337_v47  ;;  %v605_v47 = vlaneseq }
 0x20a   :  { %1567 = vmatpush3.bf16.msra.mxu1 %v1566_v44  ;;  %1351 = vmatprep.mubr.msk.f32.mxu1 %vm1789_vm0, %v1790_v1 }
 0x20b   :  { %1568 = vmatprep.subr.bf16.mxu1 %v1788_v0  ;;  %1408 = vmatprep.mubr.msk.f32.mxu0 %vm1789_vm0, %v1790_v1 }
 0x20c   :  { %1600 = vmatpush3.bf16.msra.mxu0 %v1599_v13  ;;  %v1638_v13 = vpack.c.bf16 %v971_v12, %v970_v11 }
 0x20d   :  { %1352 = vmatmul.mubr.msk.f32.vlgmr.msra.gmra.mrb[4].mxu1 %vm531_vm4, %v72_v48  ;;  %1601 = vmatprep.subr.bf16.mxu0 %v1788_v0 }
 0x20e   :  { %1570 = vmatpush3.bf16.msra.mxu1 %v1569_v49  ;;  %1362 = vmatprep.mubr.msk.f32.mxu1 %vm1789_vm0, %v1790_v1  ;;  %v606_v49 = vand.u32 127, %v605_v47 }
 0x20f   :  { %1571 = vmatprep.subr.bf16.mxu1 %v1788_v0 }
 0x210   :  { %1603 = vmatpush3.bf16.msra.mxu0 %v1602_v21  ;;  %vm607_vm5 = vcmp.ge.s32.totalorder %v606_v49, 32  ;;  %vm608_vm6 = vcmp.lt.s32.totalorder %v606_v49, 48  ;;  %v1644_v21 = vpack.c.bf16 %v975_v20, %v974_v19 }
 0x211   :  { %1604 = vmatprep.subr.bf16.mxu0 %v1788_v0  ;;  %vm609_vm7 = vmand %vm607_vm5, %vm608_vm6 }
 0x212   :  { %1573 = vmatpush3.bf16.msra.mxu1 %v1572_v52  ;;  %v1083_v52 = vld [vmem:[%s2009_s4 + $0x2] ss:$0 sm:$0xff] }
 0x213   :  { %1574 = vmatprep.subr.bf16.mxu1 %v1788_v0  ;;  %1409 = vmatmul.mubr.msk.f32.vlgmr.msra.gmra.mrb[6].mxu0 %vm82_vm1, %v1885_v16  ;;  %v874_v16 = vld [vmem:[#allocation8 + $0x4c0] sm:$0xff] }
 0x214   :  { %1443 = vmatprep.mubr.msk.f32.mxu0 %vm1789_vm0, %v1790_v1  ;;  %1606 = vmatpush3.bf16.msra.mxu0 %v1605_v25  ;;  %v1617_v35 = vpack.c.bf16 %v875_v34, %v874_v16  ;;  %v979_v16 = vld [vmem:[#allocation8 + $0x578] sm:$0xff] }
 0x215   :  { %1363 = vmatmul.mubr.msk.f32.vlgmr.msra.gmra.mrb[6].mxu1 %vm82_vm1, %v1887_v18  ;;  %v624_v18 = vld [vmem:[#allocation8 + $0x340] sm:$0xff]  ;;  %1607 = vmatprep.subr.bf16.mxu0 %v1788_v0 }
 0x216   :  { %1576 = vmatpush3.bf16.msra.mxu1 %v1575_v55  ;;  %1397 = vmatprep.mubr.msk.f32.mxu1 %vm1789_vm0, %v1790_v1  ;;  %v1587_v4 = vpack.c.bf16 %v625_v3, %v624_v18  ;;  %v964_v3 = vld [vmem:[#allocation8 + $0x500] sm:$0xff] }
 0x217   :  { %1577 = vmatprep.subr.bf16.mxu1 %v1788_v0 }
 0x218   :  { %1609 = vmatpush3.bf16.msra.mxu0 %v1608_v27 }
 0x219   :  { %1610 = vmatprep.subr.bf16.mxu0 %v1788_v0 }
 0x21a   :  { %1579 = vmatpush3.bf16.msra.mxu1 %v1578_v58  ;;  %v878_v58 = vld [vmem:[#allocation8 + $0x4e0] sm:$0xff] }
 0x21b   :  { %1580 = vmatprep.subr.bf16.mxu1 %v1788_v0 }
 0x21c   :  { %1612 = vmatpush3.bf16.msra.mxu0 %v1611_v30 }
 0x21d   :  { %1613 = vmatprep.subr.bf16.mxu0 %v1788_v0 }
 0x21e   :  { %1582 = vmatpush3.bf16.msra.mxu1 %v1581_v61  ;;  %v1623_v61 = vpack.c.bf16 %v879_v59, %v878_v58 }
 0x21f   :  { %1583 = vmatprep.subr.bf16.mxu1 %v1788_v0 }
 0x220   :  { %1615 = vmatpush3.bf16.msra.mxu0 %v1614_v33  ;;  %v978_v33 = vld [vmem:[#allocation8 + $0x570] sm:$0xff] }
 0x221   :  { %1616 = vmatprep.subr.bf16.mxu0 %v1788_v0  ;;  %v1650_v34 = vpack.c.bf16 %v979_v16, %v978_v33 }
 0x222   :  { %1585 = vmatpush3.bf16.msra.mxu1 %v1584_v2  ;;  %v881_v2 = vld [vmem:[#allocation8 + $0x4f8] sm:$0xff] }
 0x223   :  { %1586 = vmatprep.subr.bf16.mxu1 %v1788_v0  ;;  %v1626_v18 = vpack.c.bf16 %v881_v2, %v880_v63 }
 0x224   :  { %1618 = vmatpush3.bf16.msra.mxu0 %v1617_v35 }
 0x225   :  { %1619 = vmatprep.subr.bf16.mxu0 %v1788_v0 }
 0x226   :  { %1588 = vmatpush3.bf16.msra.mxu1 %v1587_v4  ;;  %v965_v4 = vld [vmem:[#allocation8 + $0x508] sm:$0xff] }
 0x227   :  { %1589 = vmatprep.subr.bf16.mxu1 %v1788_v0  ;;  %v1629_v6 = vpack.c.bf16 %v965_v4, %v964_v3 }
 0x228   :  { %1621 = vmatpush3.bf16.msra.mxu0 %v1620_v38 }
 0x229   :  { %1622 = vmatprep.subr.bf16.mxu0 %v1788_v0 }
 0x22a   :  { %1591 = vmatpush3.bf16.msra.mxu1 %v1590_v7  ;;  %v967_v7 = vld [vmem:[#allocation8 + $0x518] sm:$0xff] }
 0x22b   :  { %1592 = vmatprep.subr.bf16.mxu1 %v1788_v0  ;;  %v1632_v8 = vpack.c.bf16 %v967_v7, %v966_v5 }
 0x22c   :  { %1624 = vmatpush3.bf16.msra.mxu0 %v1623_v61 }
 0x22d   :  { %1625 = vmatprep.subr.bf16.mxu0 %v1788_v0 }
 0x22e   :  { %1594 = vmatpush3.bf16.msra.mxu1 %v1593_v10 }
 0x22f   :  { %1595 = vmatprep.subr.bf16.mxu1 %v1788_v0 }
 0x230   :  { %1627 = vmatpush3.bf16.msra.mxu0 %v1626_v18 }
 0x232   :  { %1597 = vmatpush3.bf16.msra.mxu1 %v1596_v17  ;;  %v1641_v17 = vpack.c.bf16 %v973_v15, %v972_v14 }
 0x233   :  { %1628 = vmatprep.subr.bf16.mxu1 %v1788_v0 }
 0x2dc   :  { %v429_v40 = vpop.f32.mrb[2].mxu1  ;;  %v524_v41 = vpop.f32.mrb[4].mxu0 }
 0x2dd   :  { %v525_v42 = vadd.f32 %v1085_v39, %v524_v41  ;;  %v1311_v43 = vpop.f32.mrb[3].mxu1  ;;  %v1346_v44 = vpop.f32.mrb[5].mxu0  ;;  %v430_v55 = vadd.f32 %v1083_v52, %v429_v40  ;;  %v1094_v40 = vld [vmem:[%s2009_s4 + $0x6] ss:$0 sm:$0xff] }
 0x2df   :  { %v610_v45 = vmul.f32 1.442695, %v525_v42 }
 0x2e0   :  { %v601_v46 = vpop.f32.mrb[4].mxu1 }
 0x2e1   :  { %1662 = vpow2.f32 %v610_v45  ;;  %v1353_v48 = vpop.f32.mrb[5].mxu1 }
 0x2e6   :  { %v848_v60 = vpop.f32.mrb[6].mxu0 }
 0x2e7   :  { %v1410_v62 = vpop.f32.mrb[7].mxu0 }
 0x2e8   :  { %v703_v50 = vpop.f32.mrb[6].mxu1 }
 0x2e9   :  { %v1364_v51 = vpop.f32.mrb[7].mxu1 }
 0x2eb   :  { %v1663_v53 = vpop.eup %1662 }
 0x2ec   :  { %v612_v54 = vmul.f32 %v1663_v53, %v601_v46 }
 0x2ee   :  { %v613_v56 = vsel %vm609_vm7, %v612_v54, %v525_v42 }
 0x2ef   :  { %v1970_v57 = vadd.f32 %v613_v56, %v430_v55 }
 0x2f1   :  { %1398 = vmatmul.mubr.f32.vlgmr.msra.gmra.mrb[8].mxu1 %v1970_v57 }
 0x2f2   :  { %1478 = vmatprep.mubr.msk.f32.mxu1 %vm1789_vm0, %v1790_v1  ;;  %1630 = vmatpush3.bf16.msra.mxu1 %v1629_v6  ;;  %v968_v1 = vld [vmem:[#allocation8 + $0x520] sm:$0xff] }
 0x2f3   :  { %1631 = vmatprep.subr.bf16.mxu1 %v1788_v0  ;;  %v1635_v10 = vpack.c.bf16 %v969_v9, %v968_v1 }
 0x2f6   :  { %1633 = vmatpush3.bf16.msra.mxu1 %v1632_v8 }
 0x2f7   :  { %1634 = vmatprep.subr.bf16.mxu1 %v1788_v0 }
 0x2fa   :  { %1636 = vmatpush3.bf16.msra.mxu1 %v1635_v10 }
 0x2fb   :  { %1637 = vmatprep.subr.bf16.mxu1 %v1788_v0 }
 0x2fe   :  { %1639 = vmatpush3.bf16.msra.mxu1 %v1638_v13 }
 0x2ff   :  { %1640 = vmatprep.subr.bf16.mxu1 %v1788_v0 }
 0x302   :  { %1642 = vmatpush3.bf16.msra.mxu1 %v1641_v17 }
 0x303   :  { %1643 = vmatprep.subr.bf16.mxu1 %v1788_v0 }
 0x306   :  { %1645 = vmatpush3.bf16.msra.mxu1 %v1644_v21 }
 0x307   :  { %1646 = vmatprep.subr.bf16.mxu1 %v1788_v0 }
 0x30a   :  { %1648 = vmatpush3.bf16.msra.mxu1 %v1647_v24 }
 0x30b   :  { %1649 = vmatprep.subr.bf16.mxu1 %v1788_v0  ;;  %v1092_v0 = vld [vmem:[%s2009_s4 + $0x5] ss:$0 sm:$0xff] }
 0x30e   :  { %1651 = vmatpush3.bf16.msra.mxu1 %v1650_v34 }
 0x3c4   :  { %v773_v25 = vpop.f32.mrb[8].mxu1 }
 0x3c5   :  { %v774_v26 = vadd.f32 %v773_v25, %v703_v50  ;;  %v1399_v27 = vpop.f32.mrb[9].mxu1 }
 0x3c7   :  { %v852_v29 = vadd.f32 %v848_v60, %v774_v26 }
 0x3c9   :  { %v861_v30 = vadd.f32 %v1090_v28, %v852_v29 }
 0x3cb   :  { %v863_v31 = vmul.f32 0.2, %v861_v30  ;;  %vm862_vm8 = vcmp.gt.f32.partialorder %v861_v30, 0.0 }
 0x3cd   :  { %v864_v32 = vsel %vm862_vm8, %v861_v30, %v863_v31 }
 0x3ce   :  { %1444 = vmatmul.mubr.f32.vlgmr.msra.gmra.mrb[8].mxu0 %v864_v32 }
 0x4a1   :  { %v956_v35 = vpop.f32.mrb[8].mxu0 }
 0x4a2   :  { %v957_v36 = vadd.f32 %v1092_v0, %v956_v35  ;;  %v1445_v37 = vpop.f32.mrb[9].mxu0 }
 0x4a4   :  { %vm960_vm9 = vcmp.gt.f32.partialorder %v957_v36, 0.0  ;;  %v961_v38 = vmul.f32 0.2, %v957_v36 }
 0x4a6   :  { %v962_v39 = vsel %vm960_vm9, %v957_v36, %v961_v38 }
 0x4a7   :  { %1479 = vmatmul.mubr.f32.vlgmr.msra.gmra.mrb[10].mxu1 %v962_v39 }
 0x57a   :  { %v1054_v41 = vpop.f32.mrb[10].mxu1 }
 0x57b   :  { %v1055_v42 = vadd.f32 %v1094_v40, %v1054_v41  ;;  %v1480_v43 = vpop.f32.mrb[11].mxu1 }
 0x57d   :  { %v1058_v44 = vadd.f32 %v1055_v42, %v1970_v57 }
 0x57f   :  { %1059 = vst [vmem:[#allocation10] sm:$0xff] %v1058_v44 }
 0x580   :  { %1763 = shalt.err (!%p1760_p8)
}
 0x581   :  { %s1764_s4 = scalar_lea.hbm %s2010_s5, 128 }
 0x582   :  { %p1765_p9 = scmp.ne.s32.totalorder %s2010_s5, %s1764_s4  ;;  %p1768_p10 = scmp.lt.u32.totalorder %s1764_s4, %s2010_s5 }
 0x584   :  { %p1770_p11 = pnand %p1768_p10, %p1765_p9 }
 0x586   :  { %1773 = shalt.err (!%p1770_p11)
}
 0x587   :  { %1069 = dma.vmem_to_hbm [thread:$0]  %s1067_s21, 128, %s2010_s5, [#allocation4]  }
 0x588   :  { %1780 = dma.done.wait [#allocation4], 128  }
 0x589   :  { %1781 = vsyncadd [#allocation4], 4294967168 }
 0x58a   :  { %1073 = vsyncpa [#allocation3], 1 }
 0x58b   :  { %1074 = vsyncpa [#allocation6], 1 }
 0x58c   :  { %1075 = vsyncpa [#allocation9], 1 }
 0x58d   :  { %1076 = vsyncpa [#allocation4], 1 }

</bundles_post_ra>
